<compile_context>
chip_gen: v5e
topology: v5e:2x2
jax: 0.10.0
libtpu: 0.0.40
codegen_flags: <defaults>
</compile_context>

<pallas_src>
import jax
import jax.numpy as jnp
from jax.experimental import pallas as pl
from jax.experimental.pallas import tpu as pltpu

QMIN = 0.0     # quint8 default of HistogramObserver (reduce_range=False)
QMAX = 255.0
_MAX_BLOCK_BYTES = 2 * 1024 * 1024   # <=2 MiB per block: in+out double-buffered
                                     # (~4x) stays inside v5e's 16 MiB scoped VMEM.


# ----------------------------- kernels ---------------------------------------


def _minmax_kernel(x_ref, min_ref, max_ref):
    """Partial min/max accumulation.

    grid = (P, S): P partial partitions ("parallel" -> sharded across v7x's two
    TensorCores), S reduction steps ("arbitrary"). The (8, w) output block for
    partition p stays resident in VMEM across the S axis and acts as the
    accumulator, so the hot loop is pure elementwise VPU min/max (reduce over
    sublane-groups of the tile). The single cross-lane/sublane reduce happens
    on the tiny (P*8, w) partials in the wrapper.
    """
    si = pl.program_id(1)

    @pl.when(si == 0)
    def _():
        min_ref[...] = jnp.full_like(min_ref, jnp.inf)
        max_ref[...] = jnp.full_like(max_ref, -jnp.inf)

    tm, w = x_ref.shape
    tile = x_ref[...].astype(jnp.float32).reshape(tm // 8, 8, w)
    min_ref[...] = jnp.minimum(min_ref[...], jnp.min(tile, axis=0))
    max_ref[...] = jnp.maximum(max_ref[...], jnp.max(tile, axis=0))


def _fakequant_kernel(scale_ref, zp_ref, x_ref, o_ref):
    """Elementwise quantize -> dequantize (fake quant) with saturation."""
    scale = scale_ref[0]
    zp = zp_ref[0]
    inv_scale = 1.0 / scale                       # hoisted: one scalar divide per block
    x = x_ref[...].astype(jnp.float32)
    q = jnp.round(x * inv_scale + zp)             # linear_quantize
    q = jnp.clip(q, QMIN, QMAX)                   # saturate to quint8 range
    o_ref[...] = ((q - zp) * scale).astype(o_ref.dtype)   # linear_dequantize


# ----------------------------- wrappers ---------------------------------------


def _prepare_slab(x):
    """Flatten to a lane-dense (m, w) slab plus a row-tile tm that evenly divides."""
    xf = x.reshape(-1)
    total = xf.size
    itemsize = jnp.dtype(x.dtype).itemsize
    for w in (1024, 512, 256, 128):               # widest lane dim first
        if total % w:
            continue
        m = total // w
        for tm in (512, 256, 128, 64, 32, 16, 8):
            if m % tm == 0 and tm * w * itemsize <= _MAX_BLOCK_BYTES:
                return xf.reshape(m, w), tm
    # Fallback for awkward sizes: pad with edge values (min/max unaffected,
    # fake-quant padding is dropped before the final reshape).
    pad = (-total) % (8 * 128)
    xf = jnp.pad(xf, (0, pad), mode="edge")
    return xf.reshape(-1, 128), 8


def _minmax(x2d, tm):
    m, w = x2d.shape
    n = m // tm
    p = 2 if (n >= 2 and n % 2 == 0) else 1       # 2 partials -> both TCs on v7x
    n_steps = n // p
    mn_p, mx_p = pl.pallas_call(
        _minmax_kernel,
        out_shape=(
            jax.ShapeDtypeStruct((p * 8, w), jnp.float32),
            jax.ShapeDtypeStruct((p * 8, w), jnp.float32),
        ),
        grid=(p, n_steps),
        in_specs=[pl.BlockSpec((tm, w), lambda pi, si: (pi * n_steps + si, 0))],
        out_specs=(
            pl.BlockSpec((8, w), lambda pi, si: (pi, 0)),
            pl.BlockSpec((8, w), lambda pi, si: (pi, 0)),
        ),
        compiler_params=pltpu.CompilerParams(
            dimension_semantics=("parallel", "arbitrary")),
    )(x2d)
    # Final (tiny) cross-lane reduce of the partials.
    return jnp.min(mn_p), jnp.max(mx_p)


def _fake_quant(x2d, tm, scale, zero_point):
    m, w = x2d.shape
    grid = (m // tm,)
    out = pl.pallas_call(
        _fakequant_kernel,
        out_shape=jax.ShapeDtypeStruct(x2d.shape, x2d.dtype),
        grid=grid,
        in_specs=[
            pl.BlockSpec(memory_space=pltpu.SMEM),   # scale (1,)
            pl.BlockSpec(memory_space=pltpu.SMEM),   # zero_point (1,)
            pl.BlockSpec((tm, w), lambda i: (i, 0)),
        ],
        out_specs=pl.BlockSpec((tm, w), lambda i: (i, 0)),
        compiler_params=pltpu.CompilerParams(
            dimension_semantics=("parallel",)),
    )(scale, zero_point, x2d)
    return out


def _calculate_qparams(min_val, max_val):
    """Affine quint8 qparams from observed min/max (PyTorch convention)."""
    min_neg = jnp.minimum(min_val, 0.0)
    max_pos = jnp.maximum(max_val, 0.0)
    scale = (max_pos - min_neg) / (QMAX - QMIN)
    scale = jnp.maximum(scale, jnp.float32(jnp.finfo(jnp.float32).eps))
    zero_point = QMIN - jnp.round(min_neg / scale)
    zero_point = jnp.clip(zero_point, QMIN, QMAX)
    return (scale.reshape(1).astype(jnp.float32),
            zero_point.reshape(1).astype(jnp.float32))


class QuantizedAct:
    """JAX/Pallas port of the PyTorch QuantizedAct module."""

    def __init__(self, calibration_flag=True):
        self.calibration_flag = calibration_flag
        # deterministic init, matching torch.ones(1)
        self.scale = jnp.ones((1,), jnp.float32)
        self.zero_point = jnp.ones((1,), jnp.float32)

    def __call__(self, x):
        x2d, tm = _prepare_slab(x)
        if self.calibration_flag:
            # observer: compute stats (min/max reduction kernel), pass x through
            mn, mx = _minmax(x2d, tm)
            self.scale, self.zero_point = _calculate_qparams(mn, mx)
            return x
        out2d = _fake_quant(x2d, tm, self.scale, self.zero_point)
        return out2d.reshape(-1)[: x.size].reshape(x.shape)


# ----------------------------- main -------------------------------------------

if __name__ == "__main__":
    key = jax.random.PRNGKey(0)
    x = jax.random.normal(key, (2, 4, 16, 16), dtype=jnp.float32)  # NCHW

    mod = QuantizedAct(calibration_flag=True)

    # Calibration pass: returns x unchanged, updates scale / zero_point.
    y_cal = mod(x)
    y_cal = jax.block_until_ready(y_cal)
    assert y_cal.shape == x.shape
    assert bool(jnp.allclose(y_cal, x))

    # Eval pass: quantize -> dequantize with calibrated qparams.
    mod.calibration_flag = False
    y = mod(x)
    y = jax.block_until_ready(y)
    assert y.shape == x.shape
    assert bool(jnp.all(jnp.isfinite(y)))
    # fake-quant error bounded by half a quantization step
    step = float(mod.scale[0])
    assert float(jnp.max(jnp.abs(y - x))) <= 0.5 * step + 1e-6

    print("KERNEL_OK")
</pallas_src>

<mosaic_0001>
module attributes {stable_mosaic.version = 11 : i64} {
  func.func @_minmax_kernel(%arg0: i32, %arg1: i32, %arg2: memref<8x256xf32, #tpu.memory_space<vmem>>, %arg3: memref<8x256xf32, #tpu.memory_space<vmem>>, %arg4: memref<8x256xf32, #tpu.memory_space<vmem>>) attributes {dimension_semantics = [#tpu.dimension_semantics<parallel>, #tpu.dimension_semantics<arbitrary>], iteration_bounds = array<i64: 1, 1>, scalar_prefetch = 0 : i64, scratch_operands = 0 : i64, tpu.core_type = #tpu.core_type<tc>, window_params = [{transform_indices = @transform_0, window_bounds = array<i64: 8, 256>}, {transform_indices = @transform_1, window_bounds = array<i64: 8, 256>}, {transform_indices = @transform_2, window_bounds = array<i64: 8, 256>}]} {
    %c0_i32 = arith.constant 0 : i32
    %0 = arith.cmpi eq, %arg1, %c0_i32 : i32
    %1 = arith.extui %0 : i1 to i32
    %c0_i32_0 = arith.constant 0 : i32
    %2 = arith.cmpi ne, %1, %c0_i32_0 : i32
    scf.if %2 {
      %cst_11 = arith.constant 0x7F800000 : f32
      %13 = vector.broadcast %cst_11 : f32 to vector<8x256xf32>
      %c0_12 = arith.constant 0 : index
      %c0_13 = arith.constant 0 : index
      %14 = vector.load %arg3[%c0_12, %c0_13] : memref<8x256xf32, #tpu.memory_space<vmem>>, vector<8x256xf32>
      tpu.vector_store %arg3[%c0_12, %c0_13], %13 {strides = array<i32>} : memref<8x256xf32, #tpu.memory_space<vmem>>, vector<8x256xf32>,
      %cst_14 = arith.constant 0xFF800000 : f32
      %15 = vector.broadcast %cst_14 : f32 to vector<8x256xf32>
      %c0_15 = arith.constant 0 : index
      %c0_16 = arith.constant 0 : index
      %16 = vector.load %arg4[%c0_15, %c0_16] : memref<8x256xf32, #tpu.memory_space<vmem>>, vector<8x256xf32>
      tpu.vector_store %arg4[%c0_15, %c0_16], %15 {strides = array<i32>} : memref<8x256xf32, #tpu.memory_space<vmem>>, vector<8x256xf32>,
    } else {
    }
    %c0 = arith.constant 0 : index
    %c0_1 = arith.constant 0 : index
    %3 = vector.load %arg2[%c0, %c0_1] : memref<8x256xf32, #tpu.memory_space<vmem>>, vector<8x256xf32>
    %4 = vector.shape_cast %3 : vector<8x256xf32> to vector<1x8x256xf32>
    %c0_2 = arith.constant 0 : index
    %c0_3 = arith.constant 0 : index
    %5 = vector.load %arg3[%c0_2, %c0_3] : memref<8x256xf32, #tpu.memory_space<vmem>>, vector<8x256xf32>
    %cst = arith.constant dense<0x7F800000> : vector<8x256xf32>
    %6 = vector.multi_reduction <minimumf>, %4, %cst [0] : vector<1x8x256xf32> to vector<8x256xf32>
    %7 = arith.minimumf %5, %6 : vector<8x256xf32>
    %c0_4 = arith.constant 0 : index
    %c0_5 = arith.constant 0 : index
    %8 = vector.load %arg3[%c0_4, %c0_5] : memref<8x256xf32, #tpu.memory_space<vmem>>, vector<8x256xf32>
    tpu.vector_store %arg3[%c0_4, %c0_5], %7 {strides = array<i32>} : memref<8x256xf32, #tpu.memory_space<vmem>>, vector<8x256xf32>,
    %c0_6 = arith.constant 0 : index
    %c0_7 = arith.constant 0 : index
    %9 = vector.load %arg4[%c0_6, %c0_7] : memref<8x256xf32, #tpu.memory_space<vmem>>, vector<8x256xf32>
    %cst_8 = arith.constant dense<0xFF800000> : vector<8x256xf32>
    %10 = vector.multi_reduction <maximumf>, %4, %cst_8 [0] : vector<1x8x256xf32> to vector<8x256xf32>
    %11 = arith.maximumf %9, %10 : vector<8x256xf32>
    %c0_9 = arith.constant 0 : index
    %c0_10 = arith.constant 0 : index
    %12 = vector.load %arg4[%c0_9, %c0_10] : memref<8x256xf32, #tpu.memory_space<vmem>>, vector<8x256xf32>
    tpu.vector_store %arg4[%c0_9, %c0_10], %11 {strides = array<i32>} : memref<8x256xf32, #tpu.memory_space<vmem>>, vector<8x256xf32>,
    return
  }
  func.func @transform_0(%arg0: i32, %arg1: i32) -> (i32, i32) {
    %c1_i32 = arith.constant 1 : i32
    %0 = arith.muli %arg0, %c1_i32 : i32
    %1 = arith.addi %0, %arg1 : i32
    %c0_i32 = arith.constant 0 : i32
    %c0_i32_0 = arith.constant 0 : i32
    return %1, %c0_i32 : i32, i32
  }
  func.func @transform_1(%arg0: i32, %arg1: i32) -> (i32, i32) {
    %c0_i32 = arith.constant 0 : i32
    %c0_i32_0 = arith.constant 0 : i32
    return %arg0, %c0_i32 : i32, i32
  }
  func.func @transform_2(%arg0: i32, %arg1: i32) -> (i32, i32) {
    %c0_i32 = arith.constant 0 : i32
    %c0_i32_0 = arith.constant 0 : i32
    return %arg0, %c0_i32 : i32, i32
  }
}

</mosaic_0001>

<bundles_post_ra>
// kernel: tpu_custom_call.1
= control target key start
LH: loop header
LB: loop body
LE: loop exit
PB: predicated region body
PF: predicated region fallthrough
CT: control target
= control target key end

     0   :  { %8 = vsyncpa [#allocation3], 0  ;;  %s196_s0 = inlined_call_operand.hbm [shape: f32[8,256], index: 0, kind: input, shape index: {}]   ;;  %s197_s1 = inlined_call_operand.hbm [shape: f32[8,256], index: 1, kind: output, shape index: {0}]   ;;  %s198_s2 = inlined_call_operand.hbm [shape: f32[8,256], index: 2, kind: output, shape index: {1}]  }
   0x1   :  { %9 = vsyncpa [#allocation4], 0 }
   0x2   :  { %10 = vsyncpa [#allocation7], 0  ;;  %s20_s11 = sshll.u32 %s196_s0, 4  ;;  %s169_s12 = smov [#allocation2]   ;;  %s21_s11 = int_to_ptr.hbm [resolvable:$true] %s20_s11 }
   0x3   :  { %s22_s13 = sshll.u32 %s169_s12, 4  ;;  %s23_s13 = int_to_ptr.vmem [resolvable:$true] %s22_s13 }
   0x4   :  { %25 = dma.hbm_to_vmem [thread:$0]  %s21_s11, 256, %s23_s13, [#allocation3]  }
   0x5   :  { %163 = dma.done.wait [#allocation3], 256  }
   0x6   :  { %164 = vsyncadd [#allocation3], 4294967040  ;;  %s170_s14 = smov [#allocation5]   ;;  %s60_s18 = sshll.u32 %s197_s1, 4  ;;  %v39_v0 = vld [vmem:[#allocation2] sm:$0xff]  ;;  %v40_v1 = vld [vmem:[#allocation2 + $0x8] sm:$0xff]  ;;  %s61_s18 = int_to_ptr.hbm [resolvable:$true] %s60_s18 }
   0x7   :  { %s58_s15 = sshll.u32 %s170_s14, 4  ;;  %s171_s19 = smov [#allocation6]   ;;  %45 = vst [vmem:[#allocation5] sm:$0xff] %v39_v0  ;;  %s59_s15 = int_to_ptr.vmem [resolvable:$true] %s58_s15 }
   0x8   :  { %s69_s20 = sshll.u32 %s171_s19, 4  ;;  %s71_s0 = sshll.u32 %s198_s2, 4  ;;  %46 = vst [vmem:[#allocation5 + $0x8] sm:$0xff] %v40_v1  ;;  %s70_s20 = int_to_ptr.vmem [resolvable:$true] %s69_s20  ;;  %s72_s0 = int_to_ptr.hbm [resolvable:$true] %s71_s0 }
   0x9   :  { %51 = vst [vmem:[#allocation6] sm:$0xff] %v39_v0  ;;  %63 = dma.vmem_to_hbm [thread:$0]  %s59_s15, 256, %s61_s18, [#allocation4]  }
   0xa   :  { %52 = vst [vmem:[#allocation6 + $0x8] sm:$0xff] %v40_v1 }
   0xb   :  { %74 = dma.vmem_to_hbm [thread:$0]  %s70_s20, 256, %s72_s0, [#allocation7]  }
   0xc   :  { %165 = dma.done.wait [#allocation4], 256  }
   0xd   :  { %166 = vsyncadd [#allocation4], 4294967040 }
   0xe   :  { %167 = dma.done.wait [#allocation7], 256  }
   0xf   :  { %168 = vsyncadd [#allocation7], 4294967040 }
  0x10   :  { %83 = vsyncpa [#allocation3], 1 }
  0x11   :  { %84 = vsyncpa [#allocation4], 1 }
  0x12   :  { %85 = vsyncpa [#allocation7], 1 }

</bundles_post_ra>
